<compile_context>
chip_gen: v7x
topology: tpu7x:2x2x1
jax: 0.10.0
libtpu: 0.0.40
codegen_flags: <defaults>
</compile_context>

<pallas_src>
import functools

import jax
import jax.numpy as jnp
from jax.experimental import pallas as pl
from jax.experimental.pallas import tpu as pltpu

LEAKY_SLOPE = 0.01  # PyTorch nn.LeakyReLU default


def _leaky(x):
    return jnp.where(x > 0, x, LEAKY_SLOPE * x)


def _round_up(x, m):
    return ((x + m - 1) // m) * m


# ---------------------------------------------------------------------------
# Kernel 1: fused projections + concat + input linear
# ---------------------------------------------------------------------------
def _input_fused_kernel(des_ref, tweet_ref, nc_ref,
                        wd_ref, wt_ref, wnc_ref, b0_ref,
                        wi_ref, bi_ref, o_ref):
    # Raw features arrive f32 (single HBM read); cast to bf16 on the VPU
    # right before the MXU instead of a wrapper-side cast round-trip.
    des = des_ref[...].astype(jnp.bfloat16)
    tweet = tweet_ref[...].astype(jnp.bfloat16)
    nc = nc_ref[...].astype(jnp.bfloat16)
    # Each projection weight is zero-padded to the full 128-lane width so the
    # "concat" is just a sum of lane-dense matmul results.
    h = jnp.dot(des, wd_ref[...], preferred_element_type=jnp.float32)
    h = h + jnp.dot(tweet, wt_ref[...], preferred_element_type=jnp.float32)
    h = h + jnp.dot(nc, wnc_ref[...], preferred_element_type=jnp.float32)
    h = _leaky(h + b0_ref[...])                                   # f32
    y = jnp.dot(h.astype(jnp.bfloat16), wi_ref[...],
                preferred_element_type=jnp.float32) + bi_ref[...]
    o_ref[...] = _leaky(y).astype(o_ref.dtype)


def input_fused(des, tweet, nc, wd, wt, wnc, b0, wi, bi, *, row_tile, n_tiles):
    n, emb = des.shape[0], wi.shape[1]
    row = lambda i: (i, 0)
    const = lambda i: (0, 0)
    return pl.pallas_call(
        _input_fused_kernel,
        grid=(n_tiles,),
        in_specs=[
            pl.BlockSpec((row_tile, des.shape[1]), row),
            pl.BlockSpec((row_tile, tweet.shape[1]), row),
            pl.BlockSpec((row_tile, nc.shape[1]), row),
            pl.BlockSpec(wd.shape, const),
            pl.BlockSpec(wt.shape, const),
            pl.BlockSpec(wnc.shape, const),
            pl.BlockSpec(b0.shape, const),
            pl.BlockSpec(wi.shape, const),
            pl.BlockSpec(bi.shape, const),
        ],
        out_specs=pl.BlockSpec((row_tile, emb), row),
        out_shape=jax.ShapeDtypeStruct((n, emb), jnp.bfloat16),
        compiler_params=pltpu.CompilerParams(
            dimension_semantics=("parallel",),
            vmem_limit_bytes=32 << 20),   # explicit: v5e default is only 16 MiB
    )(des, tweet, nc, wd, wt, wnc, b0, wi, bi)


# ---------------------------------------------------------------------------
# Kernel 2: BOTH SAGE blocks + output head fused (A read from HBM once total)
# ---------------------------------------------------------------------------
def _sage_head_kernel(x_ref, a_ref, invd_ref,
                      w1a_ref, b1a_ref, w2a_ref, b2a_ref,
                      w1b_ref, b1b_ref, w2b_ref, b2b_ref,
                      wo1_ref, bo1_ref, wo2_ref, bo2_ref,
                      o_ref, *, hidden):
    a = a_ref[...]          # (N, N)  bf16 unnormalized edge counts (exact ints)
    invd = invd_ref[...]    # (N, 1)  f32  reciprocal in-degree (0 if deg == 0)

    def sage_block(x, w1, b1, w2, b2):
        # conv1 (128 -> 64): single lane-dense x @ [Wl1 | Wr1], then split.
        zr = jnp.dot(x, w1, preferred_element_type=jnp.float32)
        z1 = zr[:, :hidden].astype(jnp.bfloat16)        # x @ Wl1
        r1 = zr[:, hidden:]                             # x @ Wr1 (f32)
        # mean aggregation = (A_counts @ z1) * (1/deg), 1/deg applied in f32.
        agg1 = jnp.dot(a, z1, preferred_element_type=jnp.float32) * invd
        h1 = jnp.maximum(agg1 + b1 + r1, 0.0).astype(jnp.bfloat16)  # inner ReLU
        agg2 = (jnp.dot(a, h1, preferred_element_type=jnp.float32)
                * invd).astype(jnp.bfloat16)
        # conv2 (64 -> 128): merge the two K=64 matmuls into one K=128 matmul
        # on [agg2 | h1] against [Wl2 ; Wr2].
        cat = jnp.concatenate([agg2, h1], axis=1)       # (N, 128) bf16
        y = jnp.dot(cat, w2, preferred_element_type=jnp.float32) + b2
        # trailing ReLU = outer torch.relu after each GraphSAGE
        return jnp.maximum(y, 0.0).astype(jnp.bfloat16)

    x = sage_block(x_ref[...], w1a_ref[...], b1a_ref[...],
                   w2a_ref[...], b2a_ref[...])
    x = sage_block(x, w1b_ref[...], b1b_ref[...], w2b_ref[...], b2b_ref[...])
    # fused output head: output1 (LeakyReLU) + output2 (padded to 128 lanes)
    h = _leaky(jnp.dot(x, wo1_ref[...], preferred_element_type=jnp.float32)
               + bo1_ref[...])
    y = jnp.dot(h.astype(jnp.bfloat16), wo2_ref[...],
                preferred_element_type=jnp.float32) + bo2_ref[...]
    o_ref[...] = y.astype(o_ref.dtype)


def sage_head_fused(x, adj, inv_deg, sage1_w, sage2_w, out_w, *, hidden):
    n, emb = x.shape
    args = (x, adj, inv_deg) + tuple(sage1_w) + tuple(sage2_w) + tuple(out_w)

    # Explicit, per-generation VMEM budget (review: never rely on the default
    # scoped limit, and never request all of v7x's 64 MiB).
    need = sum(int(t.size) * t.dtype.itemsize for t in args)
    need += n * emb * 4            # padded f32 logits output
    need += 8 * n * emb * 4        # live f32 intermediates inside the kernel
    try:
        phys = int(getattr(pltpu.get_tpu_info(), "vmem_capacity_bytes",
                           64 << 20))
    except Exception:
        phys = 64 << 20
    cap = (100 << 20) if phys >= (100 << 20) else (48 << 20)
    vmem_limit = min(max(int(need * 1.3) + (8 << 20), 32 << 20), cap)
    # TODO(synk): when `need` exceeds `cap` (roughly N_pad > ~4.5K on v7x or
    # ~7K on v5e/v6e), stream A from HBM in row tiles (pltpu.emit_pipeline,
    # two passes per hop with h1 in a VMEM scratch) or switch to a CSR
    # scalar-prefetch gather aggregation, and row-split across v7x's 2 TCs.

    flops = int(
        2 * (2 * n * emb * emb             # x @ [Wl1 | Wr1]
             + 2 * n * n * hidden * 2      # the two A matmuls (K = 64)
             + 2 * n * emb * emb)          # [agg2 | h1] @ [Wl2 ; Wr2]
        + 2 * (2 * n * emb * emb))         # output head (two 128x128 matmuls)
    bytes_accessed = int(sum(int(t.size) * t.dtype.itemsize for t in args)
                         + n * emb * 4)

    # No grid: single invocation, every operand fully resident in VMEM and
    # single-buffered (no 2-deep pipelining copies of the (N,N) adjacency).
    return pl.pallas_call(
        functools.partial(_sage_head_kernel, hidden=hidden),
        out_shape=jax.ShapeDtypeStruct((n, emb), jnp.float32),
        compiler_params=pltpu.CompilerParams(vmem_limit_bytes=vmem_limit),
        cost_estimate=pl.CostEstimate(flops=flops, transcendentals=0,
                                      bytes_accessed=bytes_accessed),
    )(*args)


# ---------------------------------------------------------------------------
# Parameters (deterministic, PyTorch-like uniform init)
# ---------------------------------------------------------------------------
def _init_linear(key, d_in, d_out, bias=True):
    kw, kb = jax.random.split(key)
    bound = 1.0 / jnp.sqrt(jnp.float32(d_in))
    w = jax.random.uniform(kw, (d_in, d_out), jnp.float32, -bound, bound)
    b = (jax.random.uniform(kb, (d_out,), jnp.float32, -bound, bound)
         if bias else jnp.zeros((d_out,), jnp.float32))
    return w, b


def init_params(key, des_size=768, tweet_size=768, num_prop_size=4,
                cat_prop_size=3, emb=128, hidden=64):
    keys = jax.random.split(key, 16)
    p = {}
    q = emb // 4
    p["des"] = _init_linear(keys[0], des_size, q)
    p["tweet"] = _init_linear(keys[1], tweet_size, q)
    p["num_prop"] = _init_linear(keys[2], num_prop_size, q)
    p["cat_prop"] = _init_linear(keys[3], cat_prop_size, q)
    p["input"] = _init_linear(keys[4], emb, emb)
    # PyG SAGEConv: lin_l has bias, lin_r has no bias.
    for name, koff in (("sage1", 5), ("sage2", 9)):
        wl1, bl1 = _init_linear(keys[koff + 0], emb, hidden)
        wr1, _ = _init_linear(keys[koff + 1], emb, hidden, bias=False)
        wl2, bl2 = _init_linear(keys[koff + 2], hidden, emb)
        wr2, _ = _init_linear(keys[koff + 3], hidden, emb, bias=False)
        p[name] = ((wl1, bl1, wr1), (wl2, bl2, wr2))
    p["output1"] = _init_linear(keys[13], emb, emb)
    p["output2"] = _init_linear(keys[14], emb, 2)
    return p


# ---------------------------------------------------------------------------
# Graph glue: dense adjacency as unnormalized bf16 counts + f32 1/deg vector.
# (Data-dependent scatter from edge_index stays in plain JAX.)
# ---------------------------------------------------------------------------
def build_graph(edge_index, n_pad):
    src, dst = edge_index[0], edge_index[1]
    a = jnp.zeros((n_pad, n_pad), jnp.float32).at[dst, src].add(1.0)
    deg = a.sum(axis=1, keepdims=True)
    inv_deg = jnp.where(deg > 0, 1.0 / jnp.where(deg > 0, deg, 1.0), 0.0)
    # Small integer counts are exact in bf16; 1/deg stays f32 and is applied
    # inside the kernel.
    return a.astype(jnp.bfloat16), inv_deg.astype(jnp.float32)


# ---------------------------------------------------------------------------
# Full forward
# ---------------------------------------------------------------------------
def _choose_tiling(n, max_tile=512):
    # Pad only to a multiple of 8 rows; a ragged last row-tile is handled by
    # the grid (masked boundary writes), not by inflating N (and A = O(N^2)).
    n8 = _round_up(n, 8)
    if n8 <= max_tile:
        return n8, n8, 1
    return n8, max_tile, pl.cdiv(n8, max_tile)


def _pad_rows(x, n_pad):
    return jnp.pad(x, ((0, n_pad - x.shape[0]), (0, 0)))


def bot_graphsage2_forward(params, des, tweet, num_prop, cat_prop, edge_index):
    n = des.shape[0]
    n_pad, row_tile, n_tiles = _choose_tiling(n)

    wd, bd = params["des"]
    wt, bt = params["tweet"]
    wn, bn = params["num_prop"]
    wc, bc = params["cat_prop"]
    wi, bi = params["input"]
    emb = wi.shape[0]
    q = emb // 4
    nw, cw = wn.shape[0], wc.shape[0]
    ncw = max(8, _round_up(nw + cw, 8))

    # --- pack / pad weights once (wrapper-side, plain JAX) ---
    wd_pad = jnp.zeros((wd.shape[0], emb), jnp.float32).at[:, 0:q].set(wd)
    wt_pad = jnp.zeros((wt.shape[0], emb), jnp.float32).at[:, q:2 * q].set(wt)
    wnc_pad = jnp.zeros((ncw, emb), jnp.float32)
    wnc_pad = wnc_pad.at[0:nw, 2 * q:3 * q].set(wn)
    wnc_pad = wnc_pad.at[nw:nw + cw, 3 * q:4 * q].set(wc)
    b0 = jnp.concatenate([bd, bt, bn, bc]).reshape(1, emb)
    bi2 = bi.reshape(1, emb)

    # --- inputs stay f32 (cast to bf16 inside kernel 1) ---
    des_p = _pad_rows(des, n_pad)
    tweet_p = _pad_rows(tweet, n_pad)
    nc = jnp.zeros((n_pad, ncw), jnp.float32)
    nc = nc.at[:n, 0:nw].set(num_prop).at[:n, nw:nw + cw].set(cat_prop)

    adj, inv_deg = build_graph(edge_index, n_pad)

    # --- kernel 1: projections + concat + input linear ---
    x = input_fused(des_p, tweet_p, nc,
                    wd_pad.astype(jnp.bfloat16), wt_pad.astype(jnp.bfloat16),
                    wnc_pad.astype(jnp.bfloat16), b0,
                    wi.astype(jnp.bfloat16), bi2,
                    row_tile=row_tile, n_tiles=n_tiles)

    # --- pack SAGE + output-head weights ---
    def pack_sage(name):
        (wl1, bl1, wr1), (wl2, bl2, wr2) = params[name]
        hidden = wl1.shape[1]
        assert 2 * hidden == emb
        w1 = jnp.concatenate([wl1, wr1], axis=1).astype(jnp.bfloat16)  # (128,128)
        w2 = jnp.concatenate([wl2, wr2], axis=0).astype(jnp.bfloat16)  # (128,128)
        return (w1, bl1.reshape(1, hidden), w2, bl2.reshape(1, emb)), hidden

    s1, hidden = pack_sage("sage1")
    s2, _ = pack_sage("sage2")

    wo1, bo1 = params["output1"]
    wo2, bo2 = params["output2"]
    n_cls = wo2.shape[1]
    wo2_pad = (jnp.zeros((emb, emb), jnp.float32).at[:, :n_cls].set(wo2)
               .astype(jnp.bfloat16))
    bo2_pad = jnp.zeros((1, emb), jnp.float32).at[0, :n_cls].set(bo2)
    out_w = (wo1.astype(jnp.bfloat16), bo1.reshape(1, emb), wo2_pad, bo2_pad)

    # --- kernel 2: both SAGE blocks + output head, A DMA'd once total ---
    out_pad = sage_head_fused(x, adj, inv_deg, s1, s2, out_w, hidden=hidden)
    return out_pad[:n, :n_cls]


if __name__ == "__main__":
    key = jax.random.PRNGKey(0)
    k_param, k_des, k_tweet, k_num, k_cat, k_edge = jax.random.split(key, 6)

    N_NODES = 8
    N_EDGES = 16
    DES, TWEET, NUMP, CATP, EMB = 768, 768, 4, 3, 128

    params = init_params(k_param, DES, TWEET, NUMP, CATP, EMB, hidden=64)

    des = jax.random.normal(k_des, (N_NODES, DES), jnp.float32)
    tweet = jax.random.normal(k_tweet, (N_NODES, TWEET), jnp.float32)
    num_prop = jax.random.normal(k_num, (N_NODES, NUMP), jnp.float32)
    cat_prop = jax.random.normal(k_cat, (N_NODES, CATP), jnp.float32)
    edge_index = jax.random.randint(k_edge, (2, N_EDGES), 0, N_NODES, jnp.int32)

    out = bot_graphsage2_forward(params, des, tweet, num_prop, cat_prop,
                                 edge_index)
    jax.block_until_ready(out)
    assert out.shape == (N_NODES, 2), out.shape
    print("KERNEL_OK")
</pallas_src>

<mosaic_0001>
module attributes {stable_mosaic.version = 11 : i64} {
  func.func @_input_fused_kernel(%arg0: i32, %arg1: memref<8x768xf32, #tpu.memory_space<vmem>>, %arg2: memref<8x768xf32, #tpu.memory_space<vmem>>, %arg3: memref<8x8xf32, #tpu.memory_space<vmem>>, %arg4: memref<768x128xbf16, #tpu.memory_space<vmem>>, %arg5: memref<768x128xbf16, #tpu.memory_space<vmem>>, %arg6: memref<8x128xbf16, #tpu.memory_space<vmem>>, %arg7: memref<1x128xf32, #tpu.memory_space<vmem>>, %arg8: memref<128x128xbf16, #tpu.memory_space<vmem>>, %arg9: memref<1x128xf32, #tpu.memory_space<vmem>>, %arg10: memref<8x128xbf16, #tpu.memory_space<vmem>>) attributes {dimension_semantics = [#tpu.dimension_semantics<parallel>], iteration_bounds = array<i64: 1>, scalar_prefetch = 0 : i64, scratch_operands = 0 : i64, tpu.core_type = #tpu.core_type<tc>, window_params = [{transform_indices = @transform_0, window_bounds = array<i64: 8, 768>}, {transform_indices = @transform_1, window_bounds = array<i64: 8, 768>}, {transform_indices = @transform_2, window_bounds = array<i64: 8, 8>}, {pipeline_mode = #tpu.pipeline_mode<synchronous>, transform_indices = @transform_3, window_bounds = array<i64: 768, 128>}, {pipeline_mode = #tpu.pipeline_mode<synchronous>, transform_indices = @transform_4, window_bounds = array<i64: 768, 128>}, {pipeline_mode = #tpu.pipeline_mode<synchronous>, transform_indices = @transform_5, window_bounds = array<i64: 8, 128>}, {pipeline_mode = #tpu.pipeline_mode<synchronous>, transform_indices = @transform_6, window_bounds = array<i64: 1, 128>}, {pipeline_mode = #tpu.pipeline_mode<synchronous>, transform_indices = @transform_7, window_bounds = array<i64: 128, 128>}, {pipeline_mode = #tpu.pipeline_mode<synchronous>, transform_indices = @transform_8, window_bounds = array<i64: 1, 128>}, {transform_indices = @transform_9, window_bounds = array<i64: 8, 128>}]} {
    %c0 = arith.constant 0 : index
    %c0_0 = arith.constant 0 : index
    %0 = vector.load %arg1[%c0, %c0_0] : memref<8x768xf32, #tpu.memory_space<vmem>>, vector<8x768xf32>
    %1 = arith.truncf %0 : vector<8x768xf32> to vector<8x768xbf16>
    %c0_1 = arith.constant 0 : index
    %c0_2 = arith.constant 0 : index
    %2 = vector.load %arg2[%c0_1, %c0_2] : memref<8x768xf32, #tpu.memory_space<vmem>>, vector<8x768xf32>
    %3 = arith.truncf %2 : vector<8x768xf32> to vector<8x768xbf16>
    %c0_3 = arith.constant 0 : index
    %c0_4 = arith.constant 0 : index
    %4 = vector.load %arg3[%c0_3, %c0_4] : memref<8x8xf32, #tpu.memory_space<vmem>>, vector<8x8xf32>
    %5 = arith.truncf %4 : vector<8x8xf32> to vector<8x8xbf16>
    %c0_5 = arith.constant 0 : index
    %c0_6 = arith.constant 0 : index
    %6 = vector.load %arg4[%c0_5, %c0_6] : memref<768x128xbf16, #tpu.memory_space<vmem>>, vector<768x128xbf16>
    %cst = arith.constant dense<0.000000e+00> : vector<8x128xf32>
    %7 = tpu.matmul %1, %6, %cst {dimension_numbers = #tpu.dot_dimension_numbers<[1], [0], [0], [1], [0, 0, 1, 1], [], []>} : vector<8x768xbf16>, vector<768x128xbf16>, vector<8x128xf32> -> vector<8x128xf32>
    %c0_7 = arith.constant 0 : index
    %c0_8 = arith.constant 0 : index
    %8 = vector.load %arg5[%c0_7, %c0_8] : memref<768x128xbf16, #tpu.memory_space<vmem>>, vector<768x128xbf16>
    %cst_9 = arith.constant dense<0.000000e+00> : vector<8x128xf32>
    %9 = tpu.matmul %3, %8, %cst_9 {dimension_numbers = #tpu.dot_dimension_numbers<[1], [0], [0], [1], [0, 0, 1, 1], [], []>} : vector<8x768xbf16>, vector<768x128xbf16>, vector<8x128xf32> -> vector<8x128xf32>
    %10 = arith.addf %7, %9 : vector<8x128xf32>
    %c0_10 = arith.constant 0 : index
    %c0_11 = arith.constant 0 : index
    %11 = vector.load %arg6[%c0_10, %c0_11] : memref<8x128xbf16, #tpu.memory_space<vmem>>, vector<8x128xbf16>
    %cst_12 = arith.constant dense<0.000000e+00> : vector<8x128xf32>
    %12 = tpu.matmul %5, %11, %cst_12 {dimension_numbers = #tpu.dot_dimension_numbers<[1], [0], [0], [1], [0, 0, 1, 1], [], []>} : vector<8x8xbf16>, vector<8x128xbf16>, vector<8x128xf32> -> vector<8x128xf32>
    %13 = arith.addf %10, %12 : vector<8x128xf32>
    %c0_13 = arith.constant 0 : index
    %c0_14 = arith.constant 0 : index
    %14 = vector.load %arg7[%c0_13, %c0_14] : memref<1x128xf32, #tpu.memory_space<vmem>>, vector<1x128xf32>
    %15 = vector.broadcast %14 : vector<1x128xf32> to vector<8x128xf32>
    %16 = arith.addf %13, %15 : vector<8x128xf32>
    %cst_15 = arith.constant 0.000000e+00 : f32
    %17 = vector.broadcast %cst_15 : f32 to vector<8x128xf32>
    %18 = arith.cmpf ogt, %16, %17 : vector<8x128xf32>
    %cst_16 = arith.constant 0.00999999977 : f32
    %19 = vector.broadcast %cst_16 : f32 to vector<8x128xf32>
    %20 = arith.mulf %19, %16 : vector<8x128xf32>
    %21 = arith.select %18, %16, %20 : vector<8x128xi1>, vector<8x128xf32>
    %22 = arith.truncf %21 : vector<8x128xf32> to vector<8x128xbf16>
    %c0_17 = arith.constant 0 : index
    %c0_18 = arith.constant 0 : index
    %23 = vector.load %arg8[%c0_17, %c0_18] : memref<128x128xbf16, #tpu.memory_space<vmem>>, vector<128x128xbf16>
    %cst_19 = arith.constant dense<0.000000e+00> : vector<8x128xf32>
    %24 = tpu.matmul %22, %23, %cst_19 {dimension_numbers = #tpu.dot_dimension_numbers<[1], [0], [0], [1], [0, 0, 1, 1], [], []>} : vector<8x128xbf16>, vector<128x128xbf16>, vector<8x128xf32> -> vector<8x128xf32>
    %c0_20 = arith.constant 0 : index
    %c0_21 = arith.constant 0 : index
    %25 = vector.load %arg9[%c0_20, %c0_21] : memref<1x128xf32, #tpu.memory_space<vmem>>, vector<1x128xf32>
    %26 = vector.broadcast %25 : vector<1x128xf32> to vector<8x128xf32>
    %27 = arith.addf %24, %26 : vector<8x128xf32>
    %cst_22 = arith.constant 0.000000e+00 : f32
    %28 = vector.broadcast %cst_22 : f32 to vector<8x128xf32>
    %29 = arith.cmpf ogt, %27, %28 : vector<8x128xf32>
    %cst_23 = arith.constant 0.00999999977 : f32
    %30 = vector.broadcast %cst_23 : f32 to vector<8x128xf32>
    %31 = arith.mulf %30, %27 : vector<8x128xf32>
    %32 = arith.select %29, %27, %31 : vector<8x128xi1>, vector<8x128xf32>
    %33 = arith.truncf %32 : vector<8x128xf32> to vector<8x128xbf16>
    %c0_24 = arith.constant 0 : index
    %c0_25 = arith.constant 0 : index
    %34 = vector.load %arg10[%c0_24, %c0_25] : memref<8x128xbf16, #tpu.memory_space<vmem>>, vector<8x128xbf16>
    tpu.vector_store %arg10[%c0_24, %c0_25], %33 {strides = array<i32>} : memref<8x128xbf16, #tpu.memory_space<vmem>>, vector<8x128xbf16>,
    return
  }
  func.func @transform_0(%arg0: i32) -> (i32, i32) {
    %c0_i32 = arith.constant 0 : i32
    %c0_i32_0 = arith.constant 0 : i32
    return %arg0, %c0_i32 : i32, i32
  }
  func.func @transform_1(%arg0: i32) -> (i32, i32) {
    %c0_i32 = arith.constant 0 : i32
    %c0_i32_0 = arith.constant 0 : i32
    return %arg0, %c0_i32 : i32, i32
  }
  func.func @transform_2(%arg0: i32) -> (i32, i32) {
    %c0_i32 = arith.constant 0 : i32
    %c0_i32_0 = arith.constant 0 : i32
    return %arg0, %c0_i32 : i32, i32
  }
  func.func @transform_3(%arg0: i32) -> (i32, i32) {
    %c0_i32 = arith.constant 0 : i32
    %c0_i32_0 = arith.constant 0 : i32
    %c0_i32_1 = arith.constant 0 : i32
    return %c0_i32, %c0_i32_0 : i32, i32
  }
  func.func @transform_4(%arg0: i32) -> (i32, i32) {
    %c0_i32 = arith.constant 0 : i32
    %c0_i32_0 = arith.constant 0 : i32
    %c0_i32_1 = arith.constant 0 : i32
    return %c0_i32, %c0_i32_0 : i32, i32
  }
  func.func @transform_5(%arg0: i32) -> (i32, i32) {
    %c0_i32 = arith.constant 0 : i32
    %c0_i32_0 = arith.constant 0 : i32
    %c0_i32_1 = arith.constant 0 : i32
    return %c0_i32, %c0_i32_0 : i32, i32
  }
  func.func @transform_6(%arg0: i32) -> (i32, i32) {
    %c0_i32 = arith.constant 0 : i32
    %c0_i32_0 = arith.constant 0 : i32
    %c0_i32_1 = arith.constant 0 : i32
    return %c0_i32, %c0_i32_0 : i32, i32
  }
  func.func @transform_7(%arg0: i32) -> (i32, i32) {
    %c0_i32 = arith.constant 0 : i32
    %c0_i32_0 = arith.constant 0 : i32
    %c0_i32_1 = arith.constant 0 : i32
    return %c0_i32, %c0_i32_0 : i32, i32
  }
  func.func @transform_8(%arg0: i32) -> (i32, i32) {
    %c0_i32 = arith.constant 0 : i32
    %c0_i32_0 = arith.constant 0 : i32
    %c0_i32_1 = arith.constant 0 : i32
    return %c0_i32, %c0_i32_0 : i32, i32
  }
  func.func @transform_9(%arg0: i32) -> (i32, i32) {
    %c0_i32 = arith.constant 0 : i32
    %c0_i32_0 = arith.constant 0 : i32
    return %arg0, %c0_i32 : i32, i32
  }
}

</mosaic_0001>

<bundles_post_ra>
// kernel: tpu_custom_call.1
= control target key start
LH: loop header
LB: loop body
LE: loop exit
PB: predicated region body
PF: predicated region fallthrough
CT: control target
= control target key end

     0   :  { %14 = vsyncpa [#allocation3], 0  ;;  %s2072_s0 = inlined_call_operand.hbm [shape: f32[8,768], index: 0, kind: input, shape index: {}]   ;;  %s2073_s1 = inlined_call_operand.hbm [shape: f32[8,768], index: 1, kind: input, shape index: {}]   ;;  %s2074_s2 = inlined_call_operand.hbm [shape: f32[8,8], index: 2, kind: input, shape index: {}]   ;;  %s2075_s3 = inlined_call_operand.hbm [shape: bf16[768,128], index: 3, kind: input, shape index: {}]   ;;  %s2076_s4 = inlined_call_operand.hbm [shape: bf16[768,128], index: 4, kind: input, shape index: {}]   ;;  %s2077_s5 = inlined_call_operand.vmem [shape: bf16[8,128], index: 5, kind: input, shape index: {}]   ;;  %s2078_s6 = inlined_call_operand.vmem [shape: f32[1,128], index: 6, kind: input, shape index: {}]   ;;  %s2079_s7 = inlined_call_operand.hbm [shape: bf16[128,128], index: 7, kind: input, shape index: {}]   ;;  %s2080_s8 = inlined_call_operand.vmem [shape: f32[1,128], index: 8, kind: input, shape index: {}]   ;;  %s2081_s9 = inlined_call_operand.hbm [shape: bf16[8,128], index: 9, kind: output, shape index: {}]  }
   0x1   :  { %15 = vsyncpa [#allocation6], 0 }
   0x2   :  { %16 = vsyncpa [#allocation9], 0 }
   0x3   :  { %17 = vsyncpa [#allocation12], 0 }
   0x4   :  { %18 = vsyncpa [#allocation4], 0  ;;  %s1895_s30 = smov [#allocation5]   ;;  %s1896_s11 = smov [#allocation8]  }
   0x5   :  { %s35_s10 = sshll.u32 %s1895_s30, 4  ;;  %s54_s12 = sshll.u32 %s1896_s11, 4  ;;  %s36_s10 = int_to_ptr.vmem [resolvable:$true] %s35_s10  ;;  %s1956_s12 = int_to_ptr.vmem [resolvable:$true] %s54_s12 }
   0x6   :  { %s1731_s15 = scalar_lea.hbm %s2073_s1, 768 }
   0x7   :  { %p1732_p0 = scmp.ne.s32.totalorder %s2073_s1, %s1731_s15  ;;  %p1735_p1 = scmp.lt.u32.totalorder %s1731_s15, %s2073_s1 }
   0x9   :  { %p1737_p2 = pnand %p1735_p1, %p1732_p0 }
   0xb   :  { %1740 = shalt.err (!%p1737_p2)
}
   0xc   :  { %s1741_s20 = scalar_lea.vmem %s36_s10, 768  ;;  %p1746_p4 = scmp.lt.s32.totalorder %s36_s10, %s36_s10 }
   0xd   :  { %p1742_p3 = scmp.ne.s32.totalorder %s36_s10, %s1741_s20  ;;  %p1747_p5 = scmp.lt.s32.totalorder %s1741_s20, %s1741_s20 }
   0xf   :  { %p1748_p6 = por %p1747_p5, %p1746_p4 }
  0x11   :  { %p1749_p7 = pnand %p1748_p6, %p1742_p3 }
  0x13   :  { %1752 = shalt.err (!%p1749_p7)
}
  0x14   :  { %38 = dma.hbm_to_vmem [thread:$0]  %s2073_s1, 768, %s36_s10, [#allocation6]  }
  0x15   :  { %s1753_s25 = scalar_lea.hbm %s2075_s3, 6144 }
  0x16   :  { %p1754_p8 = scmp.ne.s32.totalorder %s2075_s3, %s1753_s25  ;;  %p1757_p9 = scmp.lt.u32.totalorder %s1753_s25, %s2075_s3 }
  0x18   :  { %p1759_p10 = pnand %p1757_p9, %p1754_p8 }
  0x1a   :  { %1762 = shalt.err (!%p1759_p10)
}
  0x1b   :  { %s1763_s30 = scalar_lea.vmem %s1956_s12, 6144  ;;  %p1768_p12 = scmp.lt.s32.totalorder %s1956_s12, %s1956_s12 }
  0x1c   :  { %p1764_p11 = scmp.ne.s32.totalorder %s1956_s12, %s1763_s30  ;;  %p1769_p13 = scmp.lt.s32.totalorder %s1763_s30, %s1763_s30 }
  0x1e   :  { %p1770_p0 = por %p1769_p13, %p1768_p12 }
  0x20   :  { %p1771_p1 = pnand %p1770_p0, %p1764_p11 }
  0x22   :  { %1774 = shalt.err (!%p1771_p1)
}
  0x23   :  { %s1897_s1 = smov 64   ;;  %s1898_s10 = smov 4  }
  0x24   :  { %60 = dma.hbm_to_vmem [thread:$0]  %s2075_s3, 6144, %s1956_s12, [#allocation9], %s1897_s1, %s1897_s1, %s1898_s10  }
  0x25   :  { %s1899_s14 = smov [#allocation2]   ;;  %s1900_s16 = smov [#allocation7]  }
  0x26   :  { %s25_s15 = sshll.u32 %s1899_s14, 4  ;;  %s45_s17 = sshll.u32 %s1900_s16, 4  ;;  %s26_s15 = int_to_ptr.vmem [resolvable:$true] %s25_s15  ;;  %s46_s17 = int_to_ptr.vmem [resolvable:$true] %s45_s17 }
  0x27   :  { %s1775_s20 = scalar_lea.hbm %s2072_s0, 768 }
  0x28   :  { %p1776_p2 = scmp.ne.s32.totalorder %s2072_s0, %s1775_s20  ;;  %p1779_p3 = scmp.lt.u32.totalorder %s1775_s20, %s2072_s0 }
  0x2a   :  { %p1781_p4 = pnand %p1779_p3, %p1776_p2 }
  0x2c   :  { %1784 = shalt.err (!%p1781_p4)
}
  0x2d   :  { %s1785_s3 = scalar_lea.vmem %s26_s15, 768  ;;  %p1790_p6 = scmp.lt.s32.totalorder %s26_s15, %s26_s15 }
  0x2e   :  { %p1786_p5 = scmp.ne.s32.totalorder %s26_s15, %s1785_s3  ;;  %p1791_p7 = scmp.lt.s32.totalorder %s1785_s3, %s1785_s3 }
  0x30   :  { %p1792_p8 = por %p1791_p7, %p1790_p6 }
  0x32   :  { %p1793_p9 = pnand %p1792_p8, %p1786_p5 }
  0x34   :  { %1796 = shalt.err (!%p1793_p9)
}
  0x35   :  { %28 = dma.hbm_to_vmem [thread:$0]  %s2072_s0, 768, %s26_s15, [#allocation3]  }
  0x36   :  { %s1797_s28 = scalar_lea.hbm %s2074_s2, 128 }
  0x37   :  { %p1798_p10 = scmp.ne.s32.totalorder %s2074_s2, %s1797_s28  ;;  %p1801_p11 = scmp.lt.u32.totalorder %s1797_s28, %s2074_s2 }
  0x39   :  { %p1803_p12 = pnand %p1801_p11, %p1798_p10 }
  0x3b   :  { %1806 = shalt.err (!%p1803_p12)
}
  0x3c   :  { %s1807_s14 = scalar_lea.vmem %s46_s17, 128  ;;  %p1812_p0 = scmp.lt.s32.totalorder %s46_s17, %s46_s17 }
  0x3d   :  { %p1808_p13 = scmp.ne.s32.totalorder %s46_s17, %s1807_s14  ;;  %p1813_p1 = scmp.lt.s32.totalorder %s1807_s14, %s1807_s14 }
  0x3f   :  { %p1814_p2 = por %p1813_p1, %p1812_p0 }
  0x41   :  { %p1815_p3 = pnand %p1814_p2, %p1808_p13 }
  0x43   :  { %1818 = shalt.err (!%p1815_p3)
}
  0x44   :  { %48 = dma.hbm_to_vmem [thread:$0]  %s2074_s2, 128, %s46_s17, [#allocation6]  }
  0x45   :  { %s1901_s16 = smov [#allocation10]   ;;  %s1902_s19 = smov [#allocation11]  }
  0x46   :  { %s66_s18 = sshll.u32 %s1901_s16, 4  ;;  %s82_s20 = sshll.u32 %s1902_s19, 4  ;;  %s67_s18 = int_to_ptr.vmem [resolvable:$true] %s66_s18  ;;  %s2014_s20 = int_to_ptr.vmem [resolvable:$true] %s82_s20 }
  0x47   :  { %s1819_s23 = scalar_lea.hbm %s2076_s4, 6144 }
  0x48   :  { %p1820_p4 = scmp.ne.s32.totalorder %s2076_s4, %s1819_s23  ;;  %p1823_p5 = scmp.lt.u32.totalorder %s1819_s23, %s2076_s4 }
  0x4a   :  { %p1825_p6 = pnand %p1823_p5, %p1820_p4 }
  0x4c   :  { %1828 = shalt.err (!%p1825_p6)
}
  0x4d   :  { %s1829_s2 = scalar_lea.vmem %s67_s18, 6144  ;;  %p1834_p8 = scmp.lt.s32.totalorder %s67_s18, %s67_s18 }
  0x4e   :  { %p1830_p7 = scmp.ne.s32.totalorder %s67_s18, %s1829_s2  ;;  %p1835_p9 = scmp.lt.s32.totalorder %s1829_s2, %s1829_s2 }
  0x50   :  { %p1836_p10 = por %p1835_p9, %p1834_p8 }
  0x52   :  { %p1837_p11 = pnand %p1836_p10, %p1830_p7 }
  0x54   :  { %1840 = shalt.err (!%p1837_p11)
}
  0x55   :  { %72 = dma.hbm_to_vmem [thread:$0]  %s2076_s4, 6144, %s67_s18, [#allocation9], %s1897_s1, %s1897_s1, %s1898_s10  }
  0x56   :  { %s1841_s29 = scalar_lea.hbm %s2079_s7, 1024 }
  0x57   :  { %p1842_p12 = scmp.ne.s32.totalorder %s2079_s7, %s1841_s29  ;;  %p1845_p13 = scmp.lt.u32.totalorder %s1841_s29, %s2079_s7 }
  0x59   :  { %p1847_p0 = pnand %p1845_p13, %p1842_p12 }
  0x5b   :  { %1850 = shalt.err (!%p1847_p0)
}
  0x5c   :  { %s1851_s0 = scalar_lea.vmem %s2014_s20, 1024  ;;  %p1856_p2 = scmp.lt.s32.totalorder %s2014_s20, %s2014_s20 }
  0x5d   :  { %p1852_p1 = scmp.ne.s32.totalorder %s2014_s20, %s1851_s0  ;;  %p1857_p3 = scmp.lt.s32.totalorder %s1851_s0, %s1851_s0 }
  0x5f   :  { %p1858_p4 = por %p1857_p3, %p1856_p2 }
  0x61   :  { %p1859_p5 = pnand %p1858_p4, %p1852_p1 }
  0x63   :  { %1862 = shalt.err (!%p1859_p5)
}
  0x64   :  { %88 = dma.hbm_to_vmem [thread:$0]  %s2079_s7, 1024, %s2014_s20, [#allocation12], %s1897_s1, %s1897_s1, %s1898_s10  }
  0x65   :  { %1885 = dma.done.wait [#allocation3], 768  }
  0x66   :  { %1886 = vsyncadd [#allocation3], 4294966528 }
  0x67   :  { %1887 = dma.done.wait [#allocation6], 896  }
  0x68   :  { %1888 = vsyncadd [#allocation6], 4294966400 }
  0x69   :  { %1889 = dma.done.wait [#allocation9], 12288  }
  0x6a   :  { %1890 = vsyncadd [#allocation9], 4294955008 }
  0x6b   :  { %1891 = dma.done.wait [#allocation12], 1024  }
  0x6c   :  { %1892 = vsyncadd [#allocation12], 4294966272  ;;  %v1627_v0 = vld [vmem:[#allocation10 + $0x40] sm:$0xff]   ;;  %v1631_v4 = vld [vmem:[#allocation10 + $0x48] sm:$0xff]   ;;  %vm1149_vm0 = vcmask 1043456   ;;  %vm1904_vm1 = vmmov 0  }
  0x6d   :  { %v1628_v1 = vld [vmem:[#allocation10 + $0xc0] sm:$0xff]   ;;  %1447 = vmatprep.subr.bf16.mxu0 %v1627_v0  ;;  %v1632_v5 = vld [vmem:[#allocation10 + $0xc8] sm:$0xff]   ;;  %v1635_v8 = vld [vmem:[#allocation10 + $0x50] sm:$0xff]   ;;  %vm1145_vm2 = vcmask 64512  }
  0x6e   :  { %v1629_v2 = vld [vmem:[#allocation10] sm:$0xff]   ;;  %1469 = vmatprep.subr.bf16.mxu1 %v1628_v1  ;;  %v1633_v6 = vld [vmem:[#allocation10 + $0x8] sm:$0xff]   ;;  %v1636_v9 = vld [vmem:[#allocation10 + $0xd0] sm:$0xff]  }
  0x6f   :  { %v1630_v3 = vld [vmem:[#allocation10 + $0x80] sm:$0xff]   ;;  %1448 = vmatpush3.bf16.msra.mxu0 %v1629_v2  ;;  %v1634_v7 = vld [vmem:[#allocation10 + $0x88] sm:$0xff]   ;;  %v1637_v10 = vld [vmem:[#allocation10 + $0x10] sm:$0xff]  }
  0x70   :  { %1470 = vmatpush3.bf16.msra.mxu1 %v1630_v3  ;;  %1449 = vmatprep.subr.bf16.mxu0 %v1631_v4  ;;  %v1638_v11 = vld [vmem:[#allocation10 + $0x90] sm:$0xff]   ;;  %v1639_v12 = vld [vmem:[#allocation10 + $0x58] sm:$0xff]   ;;  %v1643_v16 = vld [vmem:[#allocation10 + $0x60] sm:$0xff]  }
  0x71   :  { %1471 = vmatprep.subr.bf16.mxu1 %v1632_v5  ;;  %v1640_v13 = vld [vmem:[#allocation10 + $0xd8] sm:$0xff]   ;;  %v1644_v17 = vld [vmem:[#allocation10 + $0xe0] sm:$0xff]   ;;  %v1647_v20 = vld [vmem:[#allocation10 + $0x68] sm:$0xff]  }
  0x72   :  { %v1641_v14 = vld [vmem:[#allocation10 + $0x18] sm:$0xff]   ;;  %v1645_v18 = vld [vmem:[#allocation10 + $0x20] sm:$0xff]   ;;  %v1648_v21 = vld [vmem:[#allocation10 + $0xe8] sm:$0xff]  }
  0x73   :  { %1450 = vmatpush3.bf16.msra.mxu0 %v1633_v6  ;;  %v1642_v15 = vld [vmem:[#allocation10 + $0x98] sm:$0xff]   ;;  %v1646_v19 = vld [vmem:[#allocation10 + $0xa0] sm:$0xff]   ;;  %v1649_v22 = vld [vmem:[#allocation10 + $0x28] sm:$0xff]  }
  0x74   :  { %1472 = vmatpush3.bf16.msra.mxu1 %v1634_v7  ;;  %1451 = vmatprep.subr.bf16.mxu0 %v1635_v8  ;;  %v1650_v23 = vld [vmem:[#allocation10 + $0xa8] sm:$0xff]   ;;  %v1651_v24 = vld [vmem:[#allocation10 + $0x70] sm:$0xff]   ;;  %v1655_v28 = vld [vmem:[#allocation10 + $0x78] sm:$0xff]  }
  0x75   :  { %1473 = vmatprep.subr.bf16.mxu1 %v1636_v9  ;;  %v1652_v25 = vld [vmem:[#allocation10 + $0xf0] sm:$0xff]   ;;  %v1656_v29 = vld [vmem:[#allocation10 + $0xf8] sm:$0xff]   ;;  %v125_v33 = vld [vmem:[#allocation5 + $0x18] sm:$0xff] }
  0x76   :  { %v1653_v26 = vld [vmem:[#allocation10 + $0x30] sm:$0xff]   ;;  %v1657_v30 = vld [vmem:[#allocation10 + $0x38] sm:$0xff]   ;;  %v122_v34 = vld [vmem:[#allocation5] sm:$0xff]  ;;  %v131_v36 = vpack.c.bf16 %v125_v33, %v125_v33 }
  0x77   :  { %1452 = vmatpush3.bf16.msra.mxu0 %v1637_v10  ;;  %v1654_v27 = vld [vmem:[#allocation10 + $0xb0] sm:$0xff]   ;;  %v1658_v31 = vld [vmem:[#allocation10 + $0xb8] sm:$0xff]   ;;  %v128_v37 = vpack.c.bf16 %v122_v34, %v122_v34  ;;  %v1659_v40 = vld [vmem:[#allocation10 + $0x140] sm:$0xff]  }
  0x78   :  { %1474 = vmatpush3.bf16.msra.mxu1 %v1638_v11  ;;  %1453 = vmatprep.subr.bf16.mxu0 %v1639_v12  ;;  %v123_v32 = vld [vmem:[#allocation5 + $0x8] sm:$0xff]  ;;  %v124_v38 = vld [vmem:[#allocation5 + $0x10] sm:$0xff]  ;;  %v1660_v41 = vld [vmem:[#allocation10 + $0x100] sm:$0xff]  }
  0x79   :  { %1475 = vmatprep.subr.bf16.mxu1 %v1640_v13  ;;  %v129_v35 = vpack.c.bf16 %v123_v32, %v123_v32  ;;  %v130_v39 = vpack.c.bf16 %v124_v38, %v124_v38  ;;  %688 = vmatprep.mubr.bf16.mxu1 %v131_v36  ;;  %v1661_v42 = vld [vmem:[#allocation8 + $0x40] sm:$0xff]   ;;  %v1663_v44 = vld [vmem:[#allocation10 + $0x148] sm:$0xff]   ;;  %v1667_v48 = vld [vmem:[#allocation10 + $0x150] sm:$0xff]  }
  0x7a   :  { %v1662_v43 = vld [vmem:[#allocation8] sm:$0xff]   ;;  %v1664_v45 = vld [vmem:[#allocation10 + $0x108] sm:$0xff]   ;;  %v1668_v49 = vld [vmem:[#allocation10 + $0x110] sm:$0xff]  }
  0x7b   :  { %1454 = vmatpush3.bf16.msra.mxu0 %v1641_v14  ;;  %648 = vmatprep.mubr.bf16.mxu0 %v129_v35  ;;  %v1665_v46 = vld [vmem:[#allocation8 + $0x48] sm:$0xff]   ;;  %v1669_v50 = vld [vmem:[#allocation8 + $0x50] sm:$0xff]   ;;  %v1671_v52 = vld [vmem:[#allocation10 + $0x158] sm:$0xff]  }
  0x7c   :  { %1476 = vmatpush3.bf16.msra.mxu1 %v1642_v15  ;;  %1455 = vmatprep.subr.bf16.mxu0 %v1643_v16  ;;  %v1666_v47 = vld [vmem:[#allocation8 + $0x8] sm:$0xff]   ;;  %v1670_v51 = vld [vmem:[#allocation8 + $0x10] sm:$0xff]   ;;  %v1672_v53 = vld [vmem:[#allocation10 + $0x118] sm:$0xff]  }
  0x7d   :  { %1477 = vmatprep.subr.bf16.mxu1 %v1644_v17  ;;  %v1673_v54 = vld [vmem:[#allocation8 + $0x58] sm:$0xff]   ;;  %v1675_v56 = vld [vmem:[#allocation10 + $0x160] sm:$0xff]   ;;  %v1679_v60 = vld [vmem:[#allocation10 + $0x168] sm:$0xff]  }
  0x7e   :  { %v1674_v55 = vld [vmem:[#allocation8 + $0x18] sm:$0xff]   ;;  %v1676_v57 = vld [vmem:[#allocation10 + $0x120] sm:$0xff]   ;;  %v1680_v61 = vld [vmem:[#allocation10 + $0x128] sm:$0xff]  }
  0x7f   :  { %1456 = vmatpush3.bf16.msra.mxu0 %v1645_v18  ;;  %v1677_v58 = vld [vmem:[#allocation8 + $0x60] sm:$0xff]   ;;  %v1681_v62 = vld [vmem:[#allocation8 + $0x68] sm:$0xff]   ;;  %v1683_v0 = vld [vmem:[#allocation10 + $0x170] sm:$0xff]  }
  0x80   :  { %1478 = vmatpush3.bf16.msra.mxu1 %v1646_v19  ;;  %1457 = vmatprep.subr.bf16.mxu0 %v1647_v20  ;;  %v1678_v59 = vld [vmem:[#allocation8 + $0x20] sm:$0xff]   ;;  %v1682_v63 = vld [vmem:[#allocation8 + $0x28] sm:$0xff]   ;;  %v1684_v1 = vld [vmem:[#allocation10 + $0x130] sm:$0xff]  }
  0x81   :  { %1479 = vmatprep.subr.bf16.mxu1 %v1648_v21  ;;  %v1685_v2 = vld [vmem:[#allocation8 + $0x70] sm:$0xff]   ;;  %v1687_v4 = vld [vmem:[#allocation10 + $0x178] sm:$0xff]   ;;  %v126_v9 = vld [vmem:[#allocation5 + $0x20] sm:$0xff] }
  0x82   :  { %v1686_v3 = vld [vmem:[#allocation8 + $0x30] sm:$0xff]   ;;  %v1688_v5 = vld [vmem:[#allocation10 + $0x138] sm:$0xff]   ;;  %v132_v11 = vpack.c.bf16 %v126_v9, %v126_v9  ;;  %v1691_v12 = vld [vmem:[#allocation8 + $0xc0] sm:$0xff]  }
  0x83   :  { %1458 = vmatpush3.bf16.msra.mxu0 %v1649_v22  ;;  %v1689_v6 = vld [vmem:[#allocation8 + $0x78] sm:$0xff]   ;;  %v127_v8 = vld [vmem:[#allocation5 + $0x28] sm:$0xff]  ;;  %v111_v13 = vld [vmem:[#allocation2 + $0x8] sm:$0xff] }
  0x84   :  { %1480 = vmatpush3.bf16.msra.mxu1 %v1650_v23  ;;  %1459 = vmatprep.subr.bf16.mxu0 %v1651_v24  ;;  %v1690_v7 = vld [vmem:[#allocation8 + $0x38] sm:$0xff]   ;;  %v133_v10 = vpack.c.bf16 %v127_v8, %v127_v8  ;;  %v117_v14 = vpack.c.bf16 %v111_v13, %v111_v13  ;;  %v1692_v15 = vld [vmem:[#allocation8 + $0x80] sm:$0xff]   ;;  %v1695_v20 = vld [vmem:[#allocation8 + $0xc8] sm:$0xff]  }
  0x85   :  { %1481 = vmatprep.subr.bf16.mxu1 %v1652_v25  ;;  %v1693_v16 = vld [vmem:[#allocation8 + $0x140] sm:$0xff]   ;;  %v110_v17 = vld [vmem:[#allocation2] sm:$0xff]  ;;  %v1696_v21 = vld [vmem:[#allocation8 + $0x88] sm:$0xff]  }
  0x86   :  { %v116_v18 = vpack.c.bf16 %v110_v17, %v110_v17  ;;  %v1694_v19 = vld [vmem:[#allocation8 + $0x100] sm:$0xff]   ;;  %v1697_v22 = vld [vmem:[#allocation8 + $0x148] sm:$0xff]   ;;  %v1699_v24 = vld [vmem:[#allocation8 + $0xd0] sm:$0xff]  }
  0x87   :  { %1460 = vmatpush3.bf16.msra.mxu0 %v1653_v26  ;;  %v1698_v23 = vld [vmem:[#allocation8 + $0x108] sm:$0xff]   ;;  %v1700_v25 = vld [vmem:[#allocation8 + $0x90] sm:$0xff]   ;;  %v1707_v32 = vld [vmem:[#allocation8 + $0xe0] sm:$0xff]  }
  0x88   :  { %1482 = vmatpush3.bf16.msra.mxu1 %v1654_v27  ;;  %1461 = vmatprep.subr.bf16.mxu0 %v1655_v28  ;;  %v1701_v26 = vld [vmem:[#allocation8 + $0x150] sm:$0xff]   ;;  %v1703_v28 = vld [vmem:[#allocation8 + $0xd8] sm:$0xff]   ;;  %v1708_v33 = vld [vmem:[#allocation8 + $0xa0] sm:$0xff]  }
  0x89   :  { %1483 = vmatprep.subr.bf16.mxu1 %v1656_v29  ;;  %v1702_v27 = vld [vmem:[#allocation8 + $0x110] sm:$0xff]   ;;  %v1704_v29 = vld [vmem:[#allocation8 + $0x98] sm:$0xff]   ;;  %v1709_v34 = vld [vmem:[#allocation8 + $0x160] sm:$0xff]  }
  0x8a   :  { %v1710_v35 = vld [vmem:[#allocation8 + $0x120] sm:$0xff]   ;;  %v1711_v36 = vld [vmem:[#allocation8 + $0xe8] sm:$0xff]  }
  0x8b   :  { %1462 = vmatpush3.bf16.msra.mxu0 %v1657_v30  ;;  %v1705_v30 = vld [vmem:[#allocation8 + $0x158] sm:$0xff]   ;;  %v1713_v38 = vld [vmem:[#allocation8 + $0x168] sm:$0xff]  }
  0x8c   :  { %1484 = vmatpush3.bf16.msra.mxu1 %v1658_v31  ;;  %1491 = vmatprep.subr.bf16.mxu0 %v1659_v40  ;;  %v1706_v31 = vld [vmem:[#allocation8 + $0x118] sm:$0xff]   ;;  %v1715_v40 = vld [vmem:[#allocation8 + $0xf0] sm:$0xff]  }
  0x8d   :  { %1513 = vmatprep.subr.bf16.mxu1 %v1661_v42  ;;  %v1717_v42 = vld [vmem:[#allocation8 + $0x170] sm:$0xff]  }
  0x8e   :  { %649 = vmatmul.mubr.bf16.vlgmr.msra.gmra.mrb[0].mxu0 %v128_v37  ;;  %v1712_v37 = vld [vmem:[#allocation8 + $0xa8] sm:$0xff]  }
  0x8f   :  { %689 = vmatmul.mubr.bf16.vlgmr.msra.gmra.mrb[0].mxu1 %v130_v39  ;;  %1492 = vmatpush3.bf16.msra.mxu0 %v1660_v41  ;;  %v1714_v39 = vld [vmem:[#allocation8 + $0x128] sm:$0xff]   ;;  %v1716_v41 = vld [vmem:[#allocation8 + $0xb0] sm:$0xff]  }
  0x90   :  { %1514 = vmatpush3.bf16.msra.mxu1 %v1662_v43  ;;  %1493 = vmatprep.subr.bf16.mxu0 %v1663_v44  ;;  %v1718_v43 = vld [vmem:[#allocation8 + $0x130] sm:$0xff]   ;;  %v1719_v44 = vld [vmem:[#allocation8 + $0xf8] sm:$0xff]  }
  0x91   :  { %1515 = vmatprep.subr.bf16.mxu1 %v1665_v46  ;;  %728 = vmatprep.mubr.bf16.mxu0 %v133_v10  ;;  %v1721_v46 = vld [vmem:[#allocation8 + $0x178] sm:$0xff]  }
  0x92   :  { %1056 = vmatprep.mubr.bf16.mxu1 %v117_v14 }
  0x93   :  { %1494 = vmatpush3.bf16.msra.mxu0 %v1664_v45  ;;  %v1720_v45 = vld [vmem:[#allocation8 + $0xb8] sm:$0xff]  }
  0x94   :  { %1516 = vmatpush3.bf16.msra.mxu1 %v1666_v47  ;;  %1495 = vmatprep.subr.bf16.mxu0 %v1667_v48  ;;  %v1722_v47 = vld [vmem:[#allocation8 + $0x138] sm:$0xff]   ;;  %v113_v48 = vld [vmem:[#allocation2 + $0x18] sm:$0xff] }
  0x95   :  { %1517 = vmatprep.subr.bf16.mxu1 %v1669_v50  ;;  %v112_v50 = vld [vmem:[#allocation2 + $0x10] sm:$0xff] }
  0x97   :  { %1496 = vmatpush3.bf16.msra.mxu0 %v1668_v49  ;;  %v119_v49 = vpack.c.bf16 %v113_v48, %v113_v48 }
  0x98   :  { %1518 = vmatpush3.bf16.msra.mxu1 %v1670_v51  ;;  %1497 = vmatprep.subr.bf16.mxu0 %v1671_v52  ;;  %v115_v51 = vld [vmem:[#allocation2 + $0x28] sm:$0xff]  ;;  %v1903_v52 = vmov 0.0  }
  0x99   :  { %1519 = vmatprep.subr.bf16.mxu1 %v1673_v54  ;;  %v118_v54 = vpack.c.bf16 %v112_v50, %v112_v50  ;;  %v1438_v50 = vld [vmem:[%s2080_s8] ss:$0 sm:$0xff] }
  0x9b   :  { %1498 = vmatpush3.bf16.msra.mxu0 %v1672_v53  ;;  %v114_v53 = vld [vmem:[#allocation2 + $0x20] sm:$0xff] }
  0x9c   :  { %1520 = vmatpush3.bf16.msra.mxu1 %v1674_v55  ;;  %1499 = vmatprep.subr.bf16.mxu0 %v1675_v56  ;;  %v121_v55 = vpack.c.bf16 %v115_v51, %v115_v51  ;;  %v120_v56 = vpack.c.bf16 %v114_v53, %v114_v53 }
  0x9d   :  { %1521 = vmatprep.subr.bf16.mxu1 %v1677_v58 }
  0x9f   :  { %1500 = vmatpush3.bf16.msra.mxu0 %v1676_v57  ;;  %v1144_v57 = vld [vmem:[%s2077_s5] sm:$0xf] }
  0xa0   :  { %1522 = vmatpush3.bf16.msra.mxu1 %v1678_v59  ;;  %1501 = vmatprep.subr.bf16.mxu0 %v1679_v60  ;;  %v1151_v58 = vsel %vm1149_vm0, %v1144_v57, 0  ;;  %v134_v59 = vld [vmem:[#allocation7] sm:$0xff] }
  0xa1   :  { %1523 = vmatprep.subr.bf16.mxu1 %v1681_v62  ;;  %v135_v60 = vpack.c.bf16 %v134_v59, %v134_v59  ;;  %v1724_v62 = vld [vmem:[#allocation11 + $0x8] sm:$0xff]  }
  0xa3   :  { %1502 = vmatpush3.bf16.msra.mxu0 %v1680_v61  ;;  %v1723_v61 = vld [vmem:[#allocation11] sm:$0xff]  }
  0xa4   :  { %1524 = vmatpush3.bf16.msra.mxu1 %v1682_v63  ;;  %1503 = vmatprep.subr.bf16.mxu0 %v1683_v0  ;;  %v1725_v63 = vld [vmem:[#allocation11 + $0x10] sm:$0xff]   ;;  %v1726_v0 = vld [vmem:[#allocation11 + $0x18] sm:$0xff]  }
  0xa5   :  { %1525 = vmatprep.subr.bf16.mxu1 %v1685_v2  ;;  %v1728_v2 = vld [vmem:[#allocation11 + $0x28] sm:$0xff]  }
  0xa7   :  { %1504 = vmatpush3.bf16.msra.mxu0 %v1684_v1  ;;  %v1727_v1 = vld [vmem:[#allocation11 + $0x20] sm:$0xff]  }
  0xa8   :  { %1526 = vmatpush3.bf16.msra.mxu1 %v1686_v3  ;;  %1505 = vmatprep.subr.bf16.mxu0 %v1687_v4  ;;  %v1729_v3 = vld [vmem:[#allocation11 + $0x30] sm:$0xff]   ;;  %v1730_v4 = vld [vmem:[#allocation11 + $0x38] sm:$0xff]  }
  0xa9   :  { %1527 = vmatprep.subr.bf16.mxu1 %v1689_v6 }
  0xab   :  { %1506 = vmatpush3.bf16.msra.mxu0 %v1688_v5 }
  0xac   :  { %1528 = vmatpush3.bf16.msra.mxu1 %v1690_v7  ;;  %1535 = vmatprep.subr.bf16.mxu0 %v1691_v12 }
  0xad   :  { %1557 = vmatprep.subr.bf16.mxu1 %v1693_v16 }
  0xae   :  { %729 = vmatmul.mubr.bf16.vlgmr.msra.gmra.mrb[4].mxu0 %v132_v11 }
  0xaf   :  { %1536 = vmatpush3.bf16.msra.mxu0 %v1692_v15  ;;  %1057 = vmatmul.mubr.bf16.vlgmr.msra.gmra.mrb[4].mxu1 %v116_v18 }
  0xb0   :  { %1558 = vmatpush3.bf16.msra.mxu1 %v1694_v19  ;;  %1537 = vmatprep.subr.bf16.mxu0 %v1695_v20 }
  0xb1   :  { %1559 = vmatprep.subr.bf16.mxu1 %v1697_v22  ;;  %1096 = vmatprep.mubr.bf16.mxu0 %v119_v49 }
  0xb2   :  { %1136 = vmatprep.mubr.bf16.mxu1 %v121_v55 }
  0xb3   :  { %1538 = vmatpush3.bf16.msra.mxu0 %v1696_v21 }
  0xb4   :  { %1560 = vmatpush3.bf16.msra.mxu1 %v1698_v23  ;;  %1539 = vmatprep.subr.bf16.mxu0 %v1699_v24 }
  0xb5   :  { %1561 = vmatprep.subr.bf16.mxu1 %v1701_v26 }
  0xb7   :  { %1540 = vmatpush3.bf16.msra.mxu0 %v1700_v25 }
  0xb8   :  { %1562 = vmatpush3.bf16.msra.mxu1 %v1702_v27  ;;  %1541 = vmatprep.subr.bf16.mxu0 %v1703_v28 }
  0xb9   :  { %1563 = vmatprep.subr.bf16.mxu1 %v1705_v30 }
  0xbb   :  { %1542 = vmatpush3.bf16.msra.mxu0 %v1704_v29 }
  0xbc   :  { %1564 = vmatpush3.bf16.msra.mxu1 %v1706_v31  ;;  %1543 = vmatprep.subr.bf16.mxu0 %v1707_v32 }
  0xbd   :  { %1565 = vmatprep.subr.bf16.mxu1 %v1709_v34 }
  0xbf   :  { %1544 = vmatpush3.bf16.msra.mxu0 %v1708_v33 }
  0xc0   :  { %1566 = vmatpush3.bf16.msra.mxu1 %v1710_v35  ;;  %1545 = vmatprep.subr.bf16.mxu0 %v1711_v36 }
  0xc1   :  { %1567 = vmatprep.subr.bf16.mxu1 %v1713_v38 }
  0xc3   :  { %1546 = vmatpush3.bf16.msra.mxu0 %v1712_v37 }
  0xc4   :  { %1568 = vmatpush3.bf16.msra.mxu1 %v1714_v39  ;;  %1547 = vmatprep.subr.bf16.mxu0 %v1715_v40 }
  0xc5   :  { %1569 = vmatprep.subr.bf16.mxu1 %v1717_v42 }
  0xc7   :  { %1548 = vmatpush3.bf16.msra.mxu0 %v1716_v41  ;;  %v1437_v41 = vld [vmem:[%s2078_s6] ss:$0 sm:$0xff]  ;;  %s1905_s6 = smov [#allocation13]  }
  0xc8   :  { %1570 = vmatpush3.bf16.msra.mxu1 %v1718_v43  ;;  %1549 = vmatprep.subr.bf16.mxu0 %v1719_v44  ;;  %s1328_s19 = sshll.u32 %s1905_s6, 4  ;;  %s1329_s19 = int_to_ptr.vmem [resolvable:$true] %s1328_s19 }
  0xc9   :  { %1571 = vmatprep.subr.bf16.mxu1 %v1721_v46  ;;  %s1863_s20 = scalar_lea.vmem %s1329_s19, 64  ;;  %p1868_p7 = scmp.lt.s32.totalorder %s1329_s19, %s1329_s19 }
  0xca   :  { %p1864_p6 = scmp.ne.s32.totalorder %s1329_s19, %s1863_s20  ;;  %p1869_p8 = scmp.lt.s32.totalorder %s1863_s20, %s1863_s20 }
  0xcb   :  { %1550 = vmatpush3.bf16.msra.mxu0 %v1720_v45 }
  0xcc   :  { %1590 = vmatprep.subr.bf16.mxu0 %v1903_v52  ;;  %1572 = vmatpush3.bf16.msra.mxu1 %v1722_v47  ;;  %p1870_p9 = por %p1869_p8, %p1868_p7 }
  0xcd   :  { %1596 = vmatprep.subr.bf16.mxu1 %v1903_v52 }
  0xce   :  { %1097 = vmatmul.mubr.bf16.vlgmr.msra.gmra.mrb[8].mxu0 %v118_v54  ;;  %p1871_p10 = pnand %p1870_p9, %p1864_p6 }
  0xcf   :  { %1591 = vmatpush3.bf16.msra.mxu0 %v1151_v58  ;;  %1592 = vmatprep.mubr.msk.bf16.mxu0 %vm1904_vm1, %v1903_v52 }
  0xd0   :  { %1137 = vmatmul.mubr.bf16.vlgmr.msra.gmra.mrb[8].mxu1 %v120_v56 }
  0xd1   :  { %1612 = vmatprep.mubr.msk.bf16.mxu1 %vm1904_vm1, %v1903_v52  ;;  %1597 = vmatpush3.bf16.msra.mxu1 %v1723_v61 }
  0xd2   :  { %1598 = vmatprep.subr.bf16.mxu1 %v1903_v52 }
  0xd5   :  { %1599 = vmatpush3.bf16.msra.mxu1 %v1724_v62 }
  0xd6   :  { %1593 = vmatmul.mubr.msk.bf16.vlgmr.msra.gmra.mrb[12].mxu0 %vm1145_vm2, %v135_v60  ;;  %1600 = vmatprep.subr.bf16.mxu1 %v1903_v52 }
  0xd9   :  { %1601 = vmatpush3.bf16.msra.mxu1 %v1725_v63 }
  0xda   :  { %1602 = vmatprep.subr.bf16.mxu1 %v1903_v52 }
  0xdd   :  { %1603 = vmatpush3.bf16.msra.mxu1 %v1726_v0 }
  0xde   :  { %1604 = vmatprep.subr.bf16.mxu1 %v1903_v52 }
  0xe1   :  { %1605 = vmatpush3.bf16.msra.mxu1 %v1727_v1 }
  0xe2   :  { %1606 = vmatprep.subr.bf16.mxu1 %v1903_v52 }
  0xe5   :  { %1607 = vmatpush3.bf16.msra.mxu1 %v1728_v2 }
  0xe6   :  { %1608 = vmatprep.subr.bf16.mxu1 %v1903_v52 }
  0xe9   :  { %1609 = vmatpush3.bf16.msra.mxu1 %v1729_v3 }
  0xea   :  { %1610 = vmatprep.subr.bf16.mxu1 %v1903_v52 }
  0xed   :  { %1611 = vmatpush3.bf16.msra.mxu1 %v1730_v4 }
 0x161   :  { %v1463_v5 = vpop.f32.mrb[0].mxu0 }
 0x162   :  { %v1485_v6 = vpop.f32.mrb[0].mxu1  ;;  %v1464_v7 = vpop.f32.mrb[1].mxu0 }
 0x163   :  { %v1486_v8 = vpop.f32.mrb[1].mxu1  ;;  %v1465_v9 = vadd.f32 %v1464_v7, %v1463_v5  ;;  %v1466_v11 = vpop.f32.mrb[2].mxu0 }
 0x164   :  { %v1487_v10 = vadd.f32 %v1486_v8, %v1485_v6  ;;  %v1488_v12 = vpop.f32.mrb[2].mxu1  ;;  %v1467_v13 = vpop.f32.mrb[3].mxu0 }
 0x165   :  { %v1489_v14 = vpop.f32.mrb[3].mxu1 }
 0x166   :  { %v691_v15 = vadd.f32 %v1487_v10, %v1465_v9 }
 0x181   :  { %v1507_v16 = vpop.f32.mrb[4].mxu0 }
 0x182   :  { %v1508_v17 = vpop.f32.mrb[5].mxu0  ;;  %v1529_v20 = vpop.f32.mrb[4].mxu1 }
 0x183   :  { %v1509_v18 = vadd.f32 %v1508_v17, %v1507_v16  ;;  %v1510_v19 = vpop.f32.mrb[6].mxu0  ;;  %v1530_v23 = vpop.f32.mrb[5].mxu1 }
 0x184   :  { %v1511_v21 = vpop.f32.mrb[7].mxu0  ;;  %v1531_v24 = vadd.f32 %v1530_v23, %v1529_v20  ;;  %v1532_v25 = vpop.f32.mrb[6].mxu1 }
 0x185   :  { %v731_v22 = vadd.f32 %v1509_v18, %v691_v15  ;;  %v1533_v26 = vpop.f32.mrb[7].mxu1 }
 0x187   :  { %v1059_v27 = vadd.f32 %v1531_v24, %v731_v22 }
 0x1a1   :  { %v1551_v28 = vpop.f32.mrb[8].mxu0 }
 0x1a2   :  { %v1552_v29 = vpop.f32.mrb[9].mxu0 }
 0x1a3   :  { %v1553_v30 = vadd.f32 %v1552_v29, %v1551_v28  ;;  %v1573_v31 = vpop.f32.mrb[8].mxu1  ;;  %v1554_v32 = vpop.f32.mrb[10].mxu0 }
 0x1a4   :  { %v1574_v33 = vpop.f32.mrb[9].mxu1  ;;  %v1555_v34 = vpop.f32.mrb[11].mxu0 }
 0x1a5   :  { %v1099_v35 = vadd.f32 %v1553_v30, %v1059_v27  ;;  %v1575_v36 = vadd.f32 %v1574_v33, %v1573_v31  ;;  %v1576_v37 = vpop.f32.mrb[10].mxu1 }
 0x1a6   :  { %v1577_v38 = vpop.f32.mrb[11].mxu1 }
 0x1a7   :  { %v1139_v39 = vadd.f32 %v1575_v36, %v1099_v35 }
 0x1a9   :  { %v1187_v40 = vpop.f32.mrb[12].mxu0 }
 0x1aa   :  { %v1193_v42 = vadd.f32 %v1187_v40, %v1139_v39  ;;  %v1594_v43 = vpop.f32.mrb[13].mxu0 }
 0x1ab   :  { %v1190_v44 = vpop.f32.mrb[14].mxu0 }
 0x1ac   :  { %v1201_v45 = vadd.f32 %v1437_v41, %v1193_v42  ;;  %v1595_v46 = vpop.f32.mrb[15].mxu0 }
 0x1ae   :  { %vm1202_vm3 = vcmp.gt.f32.partialorder %v1201_v45, 0.0  ;;  %v1203_v47 = vmul.f32 0.01, %v1201_v45 }
 0x1b0   :  { %v1204_v48 = vsel %vm1202_vm3, %v1201_v45, %v1203_v47 }
 0x1b1   :  { %v1205_v49 = vpack.c.bf16 %v1204_v48, %v1204_v48 }
 0x1b3   :  { %1613 = vmatmul.mubr.bf16.vlgmr.msra.gmra.mrb[12].mxu1 %v1205_v49 }
 0x286   :  { %v1311_v51 = vpop.f32.mrb[12].mxu1 }
 0x287   :  { %v1312_v52 = vadd.f32 %v1438_v50, %v1311_v51  ;;  %v1614_v53 = vpop.f32.mrb[13].mxu1 }
 0x288   :  { %v1314_v54 = vpop.f32.mrb[14].mxu1 }
 0x289   :  { %vm1317_vm4 = vcmp.gt.f32.partialorder %v1312_v52, 0.0  ;;  %v1318_v55 = vmul.f32 0.01, %v1312_v52  ;;  %v1615_v56 = vpop.f32.mrb[15].mxu1 }
 0x28b   :  { %v1319_v57 = vsel %vm1317_vm4, %v1312_v52, %v1318_v55 }
 0x28c   :  { %v1320_v58 = vpack.c.bf16 %v1319_v57, %v1319_v57 }
 0x28e   :  { %1321 = vst [vmem:[#allocation13] sm:$0xf] %v1320_v58 }
 0x28f   :  { %1874 = shalt.err (!%p1871_p10)
}
 0x290   :  { %s1875_s22 = scalar_lea.hbm %s2081_s9, 64 }
 0x291   :  { %p1876_p11 = scmp.ne.s32.totalorder %s2081_s9, %s1875_s22  ;;  %p1879_p12 = scmp.lt.u32.totalorder %s1875_s22, %s2081_s9 }
 0x293   :  { %p1881_p13 = pnand %p1879_p12, %p1876_p11 }
 0x295   :  { %1884 = shalt.err (!%p1881_p13)
}
 0x296   :  { %1331 = dma.vmem_to_hbm [thread:$0]  %s1329_s19, 64, %s2081_s9, [#allocation4]  }
 0x297   :  { %1893 = dma.done.wait [#allocation4], 64  }
 0x298   :  { %1894 = vsyncadd [#allocation4], 4294967232 }
 0x299   :  { %1335 = vsyncpa [#allocation3], 1 }
 0x29a   :  { %1336 = vsyncpa [#allocation6], 1 }
 0x29b   :  { %1337 = vsyncpa [#allocation9], 1 }
 0x29c   :  { %1338 = vsyncpa [#allocation12], 1 }
 0x29d   :  { %1339 = vsyncpa [#allocation4], 1 }

</bundles_post_ra>
